<compile_context>
chip_gen: v5e
topology: v5e:2x2
jax: 0.10.0
libtpu: 0.0.40
codegen_flags: <defaults>
</compile_context>

<pallas_src>
import math

import jax
import jax.numpy as jnp
from jax.experimental import pallas as pl
from jax.experimental.pallas import tpu as pltpu


def _round_up(a: int, b: int) -> int:
    return ((a + b - 1) // b) * b


def _cdiv(a: int, b: int) -> int:
    return (a + b - 1) // b


def _vmem_budget_bytes() -> int:
    """Physical VMEM capacity minus headroom for Mosaic internal scratch."""
    try:
        cap = int(pltpu.get_tpu_info().vmem_capacity_bytes)
    except Exception:
        cap = 64 * 1024 * 1024  # conservative: v7x has 64 MiB per TensorCore
    return max(16 * 1024 * 1024, cap - 8 * 1024 * 1024)


# ----------------------------------------------------------------------------
# Prologue: wt[k, n_tile] = softmax(weight[n_tile, k], axis=-1).T
# Softmax is row-wise over K, so each (tn, K) block is self-contained.
# ----------------------------------------------------------------------------
def softmax_t_kernel(w_ref, wt_ref):
    w = w_ref[...].astype(jnp.float32)            # softmax math stays f32
    w = w - jnp.max(w, axis=-1, keepdims=True)
    e = jnp.exp(w)
    denom = jnp.sum(e, axis=-1, keepdims=True)
    inv = pl.reciprocal(denom, approx=True)       # EUP vrcp slot
    inv = inv * (2.0 - denom * inv)               # one Newton step -> ~f32 exact
    wt_ref[...] = (e * inv).T.astype(wt_ref.dtype)


# ----------------------------------------------------------------------------
# Main kernel: one (TM, TN) output tile = single MXU matmul, f32 accumulation.
# ----------------------------------------------------------------------------
def weighted_linear_kernel(x_ref, wt_ref, o_ref):
    o_ref[...] = jnp.dot(
        x_ref[...], wt_ref[...], preferred_element_type=jnp.float32
    ).astype(o_ref.dtype)


@jax.jit
def weighted_linear(x, weight):
    """x: (..., in_features); weight: (out_features, in_features)."""
    out_features, in_features = weight.shape
    lead_shape = x.shape[:-1]
    m = int(math.prod(lead_shape)) if lead_shape else 1
    k = in_features
    x2d = x.reshape(m, k)

    itemsize = jnp.dtype(x.dtype).itemsize
    budget = _vmem_budget_bytes()

    # --- N tiling: lane-dense multiples of 128, even divide, tn <= 512 ------
    n_pad0 = _round_up(out_features, 128)
    n_tiles = max(1, _cdiv(n_pad0, 512))
    tn = _round_up(_cdiv(n_pad0, n_tiles), 128)
    n_pad = tn * n_tiles

    # --- M tiling: biggest TM that fits the VMEM budget, even divide --------
    tm_cap = 1024
    while True:
        m_tiles = max(1, _cdiv(m, tm_cap))
        tm = _round_up(_cdiv(m, m_tiles), 8)
        m_pad = tm * m_tiles
        # double-buffered x tile + wt tile + out tile
        per_step = (2 * tm * k + 2 * k * tn + 2 * tm * tn) * itemsize
        if per_step <= budget or tm_cap <= 8:
            break
        tm_cap //= 2
    # TODO(synk): K (in_features) is never tiled; a very large K would also
    # need a reduction grid axis (and would blow the prologue's (tn, K) block).

    if m_pad != m:
        x2d = jnp.pad(x2d, ((0, m_pad - m), (0, 0)))
    w_pad = weight
    if n_pad != out_features:
        # Zero rows softmax to a uniform distribution; their outputs are
        # discarded by the slice after the kernel.
        w_pad = jnp.pad(weight, ((0, n_pad - out_features), (0, 0)))

    # --- prologue pallas_call: softmax(weight).T, padded ---------------------
    compute_dtype = x.dtype  # bf16 inputs -> bf16 MXU operands; f32 stays f32
    # TODO(synk): when looser precision is acceptable for f32 inputs, store wt
    # in bf16 and cast x tiles to bf16 for full-rate MXU on v6e/v7x.
    pro_bytes = (2 * tn * k * jnp.dtype(weight.dtype).itemsize
                 + 2 * k * tn * itemsize
                 + tn * k * 8)  # slack for f32 intermediates
    wt = pl.pallas_call(
        softmax_t_kernel,
        out_shape=jax.ShapeDtypeStruct((k, n_pad), compute_dtype),
        grid_spec=pltpu.PrefetchScalarGridSpec(
            num_scalar_prefetch=0,
            grid=(n_pad // tn,),
            in_specs=[pl.BlockSpec((tn, k), lambda j: (j, 0))],
            out_specs=pl.BlockSpec((k, tn), lambda j: (0, j)),
        ),
        compiler_params=pltpu.CompilerParams(
            dimension_semantics=("parallel",),
            vmem_limit_bytes=min(budget, max(32 * 1024 * 1024, int(pro_bytes * 2))),
        ),
    )(w_pad)

    # --- main matmul pallas_call ---------------------------------------------
    main_bytes = (2 * tm * k + 2 * k * tn + 2 * tm * tn) * itemsize
    vmem_limit = min(budget, max(32 * 1024 * 1024, int(main_bytes * 2)))

    out2d = pl.pallas_call(
        weighted_linear_kernel,
        out_shape=jax.ShapeDtypeStruct((m_pad, n_pad), x.dtype),
        grid_spec=pltpu.PrefetchScalarGridSpec(
            num_scalar_prefetch=0,
            grid=(m_pad // tm, n_pad // tn),
            in_specs=[
                pl.BlockSpec((tm, k), lambda i, j: (i, 0)),   # streamed x tiles
                pl.BlockSpec((k, tn), lambda i, j: (0, j)),   # softmaxed weight.T
            ],
            out_specs=pl.BlockSpec((tm, tn), lambda i, j: (i, j)),
        ),
        compiler_params=pltpu.CompilerParams(
            # Both axes independent -> megacore can shard them (v7x 2 TCs).
            dimension_semantics=("parallel", "parallel"),
            vmem_limit_bytes=vmem_limit,
        ),
    )(x2d, wt)

    out2d = out2d[:m, :out_features]
    return out2d.reshape(*lead_shape, out_features)


def init_weight(key, out_features, in_features, dtype=jnp.float32):
    # Matches nn.init.kaiming_uniform_(w, a=sqrt(5)) for a (out, in) matrix:
    # gain = sqrt(2/(1+5)); bound = gain * sqrt(3/fan_in) = 1/sqrt(fan_in)
    bound = 1.0 / math.sqrt(in_features)
    return jax.random.uniform(
        key, (out_features, in_features), dtype=dtype, minval=-bound, maxval=bound
    )


if __name__ == "__main__":
    key = jax.random.PRNGKey(0)
    k_x, k_w = jax.random.split(key)

    batch, seq, in_features, out_features = 2, 8, 32, 16
    x = jax.random.normal(k_x, (batch, seq, in_features), dtype=jnp.float32)
    weight = init_weight(k_w, out_features, in_features)

    out = weighted_linear(x, weight)
    out = jax.block_until_ready(out)

    # Reference check in plain JAX (same math as the PyTorch module).
    w_soft = jax.nn.softmax(weight.astype(jnp.float32), axis=-1)
    ref = jnp.einsum(
        "bsi,oi->bso", x, w_soft, precision=jax.lax.Precision.HIGHEST
    ).astype(x.dtype)

    assert out.shape == (batch, seq, out_features)
    assert jnp.allclose(out, ref, atol=1e-4, rtol=1e-4)

    print("KERNEL_OK")
</pallas_src>

<mosaic_0001>
module attributes {stable_mosaic.version = 11 : i64} {
  func.func @weighted_linear_kernel(%arg0: i32, %arg1: i32, %arg2: memref<16x32xf32, #tpu.memory_space<vmem>>, %arg3: memref<32x128xf32, #tpu.memory_space<vmem>>, %arg4: memref<16x128xf32, #tpu.memory_space<vmem>>) attributes {dimension_semantics = [#tpu.dimension_semantics<parallel>, #tpu.dimension_semantics<parallel>], iteration_bounds = array<i64: 1, 1>, scalar_prefetch = 0 : i64, scratch_operands = 0 : i64, tpu.core_type = #tpu.core_type<tc>, window_params = [{transform_indices = @transform_0, window_bounds = array<i64: 16, 32>}, {transform_indices = @transform_1, window_bounds = array<i64: 32, 128>}, {transform_indices = @transform_2, window_bounds = array<i64: 16, 128>}]} {
    %c0 = arith.constant 0 : index
    %c0_0 = arith.constant 0 : index
    %0 = vector.load %arg2[%c0, %c0_0] : memref<16x32xf32, #tpu.memory_space<vmem>>, vector<16x32xf32>
    %c0_1 = arith.constant 0 : index
    %c0_2 = arith.constant 0 : index
    %1 = vector.load %arg3[%c0_1, %c0_2] : memref<32x128xf32, #tpu.memory_space<vmem>>, vector<32x128xf32>
    %cst = arith.constant dense<0.000000e+00> : vector<16x128xf32>
    %2 = tpu.matmul %0, %1, %cst {dimension_numbers = #tpu.dot_dimension_numbers<[1], [0], [0], [1], [0, 0, 1, 1], [], []>} : vector<16x32xf32>, vector<32x128xf32>, vector<16x128xf32> -> vector<16x128xf32>
    %c0_3 = arith.constant 0 : index
    %c0_4 = arith.constant 0 : index
    %3 = vector.load %arg4[%c0_3, %c0_4] : memref<16x128xf32, #tpu.memory_space<vmem>>, vector<16x128xf32>
    tpu.vector_store %arg4[%c0_3, %c0_4], %2 {strides = array<i32>} : memref<16x128xf32, #tpu.memory_space<vmem>>, vector<16x128xf32>,
    return
  }
  func.func @transform_0(%arg0: i32, %arg1: i32) -> (i32, i32) {
    %c0_i32 = arith.constant 0 : i32
    %c0_i32_0 = arith.constant 0 : i32
    return %arg0, %c0_i32 : i32, i32
  }
  func.func @transform_1(%arg0: i32, %arg1: i32) -> (i32, i32) {
    %c0_i32 = arith.constant 0 : i32
    %c0_i32_0 = arith.constant 0 : i32
    return %c0_i32, %arg1 : i32, i32
  }
  func.func @transform_2(%arg0: i32, %arg1: i32) -> (i32, i32) {
    %c0_i32 = arith.constant 0 : i32
    return %arg0, %arg1 : i32, i32
  }
}

module attributes {stable_mosaic.version = 11 : i64} {
  func.func @softmax_t_kernel(%arg0: i32, %arg1: memref<128x32xf32, #tpu.memory_space<vmem>>, %arg2: memref<32x128xf32, #tpu.memory_space<vmem>>) attributes {dimension_semantics = [#tpu.dimension_semantics<parallel>], iteration_bounds = array<i64: 1>, scalar_prefetch = 0 : i64, scratch_operands = 0 : i64, tpu.core_type = #tpu.core_type<tc>, window_params = [{transform_indices = @transform_0, window_bounds = array<i64: 128, 32>}, {transform_indices = @transform_1, window_bounds = array<i64: 32, 128>}]} {
    %c0 = arith.constant 0 : index
    %c0_0 = arith.constant 0 : index
    %0 = vector.load %arg1[%c0, %c0_0] : memref<128x32xf32, #tpu.memory_space<vmem>>, vector<128x32xf32>
    %cst = arith.constant dense<0xFF800000> : vector<128xf32>
    %1 = vector.multi_reduction <maximumf>, %0, %cst [1] : vector<128x32xf32> to vector<128xf32>
    %2 = vector.shape_cast %1 : vector<128xf32> to vector<128x1xf32>
    %3 = vector.broadcast %2 : vector<128x1xf32> to vector<128x32xf32>
    %4 = arith.subf %0, %3 : vector<128x32xf32>
    %5 = math.exp %4 : vector<128x32xf32>
    %cst_1 = arith.constant dense<0.000000e+00> : vector<128xf32>
    %6 = vector.multi_reduction <add>, %5, %cst_1 [1] : vector<128x32xf32> to vector<128xf32>
    %7 = vector.shape_cast %6 : vector<128xf32> to vector<128x1xf32>
    %8 = tpu.reciprocal %7 {approx = true} : vector<128x1xf32> -> vector<128x1xf32>
    %9 = arith.mulf %7, %8 : vector<128x1xf32>
    %cst_2 = arith.constant 2.000000e+00 : f32
    %10 = vector.broadcast %cst_2 : f32 to vector<128x1xf32>
    %11 = arith.subf %10, %9 : vector<128x1xf32>
    %12 = arith.mulf %8, %11 : vector<128x1xf32>
    %13 = vector.broadcast %12 : vector<128x1xf32> to vector<128x32xf32>
    %14 = arith.mulf %5, %13 : vector<128x32xf32>
    %15 = tpu.transpose %14, [1, 0] : vector<128x32xf32> -> vector<32x128xf32>
    %c0_3 = arith.constant 0 : index
    %c0_4 = arith.constant 0 : index
    %16 = vector.load %arg2[%c0_3, %c0_4] : memref<32x128xf32, #tpu.memory_space<vmem>>, vector<32x128xf32>
    tpu.vector_store %arg2[%c0_3, %c0_4], %15 {strides = array<i32>} : memref<32x128xf32, #tpu.memory_space<vmem>>, vector<32x128xf32>,
    return
  }
  func.func @transform_0(%arg0: i32) -> (i32, i32) {
    %c0_i32 = arith.constant 0 : i32
    %c0_i32_0 = arith.constant 0 : i32
    return %arg0, %c0_i32 : i32, i32
  }
  func.func @transform_1(%arg0: i32) -> (i32, i32) {
    %c0_i32 = arith.constant 0 : i32
    %c0_i32_0 = arith.constant 0 : i32
    return %c0_i32, %arg0 : i32, i32
  }
}

</mosaic_0001>

<bundles_post_ra>
// kernel: weighted_linear.3
= control target key start
LH: loop header
LB: loop body
LE: loop exit
PB: predicated region body
PF: predicated region fallthrough
CT: control target
= control target key end

     0   :  { %vm17_vm0 = vcmask 261120   ;;  %s98_s1 = inlined_call_operand.vmem [shape: f32[32,128], index: 1, kind: input, shape index: {}]   ;;  %s99_s0 = inlined_call_operand.vmem [shape: f32[16,32], index: 0, kind: input, shape index: {}]   ;;  %s100_s2 = inlined_call_operand.vmem [shape: f32[16,128], index: 2, kind: output, shape index: {}]  }
   0x1   :  { %v16_v0 = vld [vmem:[%s98_s1 + $0x18] sm:$0xff]  ;;  %v15_v1 = vld [vmem:[%s98_s1 + $0x10] sm:$0xff]  ;;  %v14_v2 = vld [vmem:[%s98_s1 + $0x8] sm:$0xff] }
   0x2   :  { %36 = vmatpush.msra.mxu0 %v16_v0  ;;  %55 = vmatpush.msra.mxu1 %v16_v0  ;;  %v13_v3 = vld [vmem:[%s98_s1] sm:$0xff]  ;;  %v12_v5 = vld [vmem:[%s99_s0 + $0x8] sm:$0xff] }
   0x3   :  { %v11_v4 = vld [vmem:[%s99_s0] sm:$0xff] }
   0x4   :  { %37 = vmatpush.msra.mxu0 %v15_v1  ;;  %56 = vmatpush.msra.mxu1 %v15_v1 }
   0x6   :  { %38 = vmatpush.msra.mxu0 %v14_v2  ;;  %57 = vmatpush.msra.mxu1 %v14_v2 }
   0x8   :  { %39 = vmatpush.msra.mxu0 %v13_v3  ;;  %58 = vmatpush.msra.mxu1 %v13_v3 }
   0x9   :  { %53 = vmatmul.msk.f32.vlgmr.msra.gmra.mxu0 %vm17_vm0, %v11_v4  ;;  %54 = vmatmul.msk.f32.vlgmr.msra.gmra.mxu1 %vm17_vm0, %v12_v5 }
  0x86   :  { %v41_v6 = vpop.f32.mrf.mxu0  ;;  %v44_v7 = vpop.f32.mrf.mxu1 }
  0x87   :  { %47 = vst [vmem:[%s100_s2] sm:$0xff] %v41_v6 }
  0x88   :  { %48 = vst [vmem:[%s100_s2 + $0x8] sm:$0xff] %v44_v7 }

// kernel: weighted_linear.2
= control target key start
LH: loop header
LB: loop body
LE: loop exit
PB: predicated region body
PF: predicated region fallthrough
CT: control target
= control target key end

     0   :  { %vm24_vm0 = vcmask 261120   ;;  %s563_s0 = inlined_call_operand.vmem [shape: f32[128,32], index: 0, kind: input, shape index: {}]   ;;  %s564_s1 = inlined_call_operand.vmem [shape: f32[32,128], index: 1, kind: output, shape index: {}]  }
   0x1   :  { %v366_v0 = vld [vmem:[%s563_s0 + $0x20] sm:$0xff]  ;;  %v10_v1 = vld [vmem:[%s563_s0 + $0x10] sm:$0xff]  ;;  %v13_v6 = vld [vmem:[%s563_s0 + $0x28] sm:$0xff] }
   0x2   :  { %v8_v2 = vld [vmem:[%s563_s0] sm:$0xff]  ;;  %v37_v3 = vsel %vm24_vm0, %v366_v0, -inf  ;;  %v31_v4 = vsel %vm24_vm0, %v10_v1, -inf  ;;  %v11_v7 = vld [vmem:[%s563_s0 + $0x18] sm:$0xff]  ;;  %v9_v8 = vld [vmem:[%s563_s0 + $0x8] sm:$0xff]  ;;  %v40_v9 = vsel %vm24_vm0, %v13_v6, -inf }
   0x3   :  { %v25_v5 = vsel %vm24_vm0, %v8_v2, -inf  ;;  %38 = vmax.xlane.f32.xlu2 %v37_v3  ;;  %32 = vmax.xlane.f32.xlu1 %v31_v4  ;;  %v34_v10 = vsel %vm24_vm0, %v11_v7, -inf  ;;  %v28_v11 = vsel %vm24_vm0, %v9_v8, -inf  ;;  %v393_v12 = vld [vmem:[%s563_s0 + $0x40] sm:$0xff]  ;;  %v398_v13 = vld [vmem:[%s563_s0 + $0x38] sm:$0xff]  ;;  %v403_v14 = vld [vmem:[%s563_s0 + $0x30] sm:$0xff] }
   0x4   :  { %26 = vmax.xlane.f32.xlu0 %v25_v5  ;;  %v49_v15 = vsel %vm24_vm0, %v393_v12, -inf  ;;  %v46_v16 = vsel %vm24_vm0, %v398_v13, -inf  ;;  %v43_v17 = vsel %vm24_vm0, %v403_v14, -inf  ;;  %v414_v18 = vld [vmem:[%s563_s0 + $0x58] sm:$0xff]  ;;  %v419_v19 = vld [vmem:[%s563_s0 + $0x50] sm:$0xff]  ;;  %v424_v20 = vld [vmem:[%s563_s0 + $0x48] sm:$0xff] }
   0x5   :  { %v58_v21 = vsel %vm24_vm0, %v414_v18, -inf  ;;  %v55_v22 = vsel %vm24_vm0, %v419_v19, -inf  ;;  %v52_v23 = vsel %vm24_vm0, %v424_v20, -inf  ;;  %v435_v24 = vld [vmem:[%s563_s0 + $0x70] sm:$0xff]  ;;  %v440_v25 = vld [vmem:[%s563_s0 + $0x68] sm:$0xff]  ;;  %v445_v26 = vld [vmem:[%s563_s0 + $0x60] sm:$0xff] }
   0x6   :  { %v67_v27 = vsel %vm24_vm0, %v435_v24, -inf  ;;  %v64_v28 = vsel %vm24_vm0, %v440_v25, -inf  ;;  %v61_v29 = vsel %vm24_vm0, %v445_v26, -inf  ;;  %v456_v30 = vld [vmem:[%s563_s0 + $0x78] sm:$0xff] }
   0x7   :  { %v70_v31 = vsel %vm24_vm0, %v456_v30, -inf }
   0xb   :  { %41 = vmax.xlane.f32.xlu2 %v40_v9  ;;  %35 = vmax.xlane.f32.xlu1 %v34_v10 }
   0xc   :  { %29 = vmax.xlane.f32.xlu0 %v28_v11 }
  0x13   :  { %50 = vmax.xlane.f32.xlu2 %v49_v15  ;;  %47 = vmax.xlane.f32.xlu1 %v46_v16 }
  0x14   :  { %44 = vmax.xlane.f32.xlu0 %v43_v17 }
  0x1b   :  { %59 = vmax.xlane.f32.xlu2 %v58_v21  ;;  %56 = vmax.xlane.f32.xlu1 %v55_v22 }
  0x1c   :  { %53 = vmax.xlane.f32.xlu0 %v52_v23 }
  0x23   :  { %68 = vmax.xlane.f32.xlu2 %v67_v27  ;;  %65 = vmax.xlane.f32.xlu1 %v64_v28 }
  0x24   :  { %62 = vmax.xlane.f32.xlu0 %v61_v29 }
  0x2c   :  { %71 = vmax.xlane.f32.xlu0 %v70_v31 }
  0x76   :  { %v39_v32 = vpop.xlane.xlu2 %38  ;;  %v33_v33 = vpop.xlane.xlu1 %32 }
  0x77   :  { %v75_v34 = vsub.f32 %v10_v1, %v33_v33  ;;  %v27_v35 = vpop.xlane.xlu0 %26  ;;  %v77_v45 = vsub.f32 %v366_v0, %v39_v32 }
  0x78   :  { %v73_v36 = vsub.f32 %v8_v2, %v27_v35 }
  0x79   :  { %v93_v37 = vmul.f32 1.442695, %v75_v34  ;;  %v97_v53 = vmul.f32 1.442695, %v77_v45 }
  0x7a   :  { %v89_v38 = vmul.f32 1.442695, %v73_v36 }
  0x7b   :  { %289 = vpow2.f32 %v93_v37 }
  0x7c   :  { %291 = vpow2.f32 %v89_v38 }
  0x7e   :  { %v42_v39 = vpop.xlane.xlu2 %41  ;;  %v36_v40 = vpop.xlane.xlu1 %35 }
  0x7f   :  { %v78_v41 = vsub.f32 %v13_v6, %v42_v39  ;;  %v76_v42 = vsub.f32 %v11_v7, %v36_v40  ;;  %v30_v43 = vpop.xlane.xlu0 %29 }
  0x80   :  { %v74_v44 = vsub.f32 %v9_v8, %v30_v43 }
  0x81   :  { %v99_v46 = vmul.f32 1.442695, %v78_v41  ;;  %v95_v47 = vmul.f32 1.442695, %v76_v42  ;;  %v461_v48 = vpop.eup %289 }
  0x82   :  { %v91_v49 = vmul.f32 1.442695, %v74_v44  ;;  %v463_v50 = vpop.eup %291  ;;  %v127_v51 = vsel %vm24_vm0, %v461_v48, 0.0 }
  0x83   :  { %293 = vpow2.f32 %v99_v46  ;;  %128 = vadd.xlane.f32.xlu0 %v127_v51  ;;  %v121_v52 = vsel %vm24_vm0, %v463_v50, 0.0 }
  0x84   :  { %295 = vpow2.f32 %v95_v47  ;;  %122 = vadd.xlane.f32.xlu1 %v121_v52 }
  0x85   :  { %297 = vpow2.f32 %v91_v49 }
  0x86   :  { %v51_v54 = vpop.xlane.xlu2 %50  ;;  %v48_v55 = vpop.xlane.xlu1 %47  ;;  %299 = vpow2.f32 %v97_v53 }
  0x87   :  { %v81_v56 = vsub.f32 %v393_v12, %v51_v54  ;;  %v45_v57 = vpop.xlane.xlu0 %44  ;;  %v80_v61 = vsub.f32 %v398_v13, %v48_v55 }
  0x88   :  { %v79_v58 = vsub.f32 %v403_v14, %v45_v57 }
  0x89   :  { %v471_v59 = vpop.eup %293  ;;  %v105_v60 = vmul.f32 1.442695, %v81_v56  ;;  %v103_v4 = vmul.f32 1.442695, %v80_v61 }
  0x8a   :  { %v474_v62 = vpop.eup %295  ;;  %v101_v63 = vmul.f32 1.442695, %v79_v58  ;;  %v136_v0 = vsel %vm24_vm0, %v471_v59, 0.0 }
  0x8b   :  { %v478_v1 = vpop.eup %297  ;;  %301 = vpow2.f32 %v105_v60  ;;  %v130_v2 = vsel %vm24_vm0, %v474_v62, 0.0  ;;  %137 = vadd.xlane.f32.xlu0 %v136_v0 }
  0x8c   :  { %303 = vpow2.f32 %v101_v63  ;;  %v124_v3 = vsel %vm24_vm0, %v478_v1, 0.0  ;;  %131 = vadd.xlane.f32.xlu1 %v130_v2  ;;  %v484_v7 = vpop.eup %299 }
  0x8d   :  { %125 = vadd.xlane.f32.xlu2 %v124_v3  ;;  %305 = vpow2.f32 %v103_v4  ;;  %v133_v17 = vsel %vm24_vm0, %v484_v7, 0.0 }
  0x8e   :  { %v60_v5 = vpop.xlane.xlu2 %59  ;;  %v57_v6 = vpop.xlane.xlu1 %56 }
  0x8f   :  { %v84_v8 = vsub.f32 %v414_v18, %v60_v5  ;;  %v54_v9 = vpop.xlane.xlu0 %53  ;;  %v83_v13 = vsub.f32 %v419_v19, %v57_v6 }
  0x90   :  { %v82_v10 = vsub.f32 %v424_v20, %v54_v9 }
  0x91   :  { %v488_v11 = vpop.eup %301  ;;  %v111_v12 = vmul.f32 1.442695, %v84_v8  ;;  %v109_v20 = vmul.f32 1.442695, %v83_v13 }
  0x92   :  { %v491_v14 = vpop.eup %303  ;;  %v107_v15 = vmul.f32 1.442695, %v82_v10  ;;  %v145_v16 = vsel %vm24_vm0, %v488_v11, 0.0 }
  0x93   :  { %307 = vpow2.f32 %v111_v12  ;;  %v139_v18 = vsel %vm24_vm0, %v491_v14, 0.0  ;;  %146 = vadd.xlane.f32.xlu0 %v145_v16  ;;  %v499_v22 = vpop.eup %305 }
  0x94   :  { %309 = vpow2.f32 %v107_v15  ;;  %140 = vadd.xlane.f32.xlu1 %v139_v18  ;;  %v142_v36 = vsel %vm24_vm0, %v499_v22, 0.0 }
  0x95   :  { %134 = vadd.xlane.f32.xlu2 %v133_v17  ;;  %311 = vpow2.f32 %v109_v20 }
  0x96   :  { %v69_v21 = vpop.xlane.xlu2 %68  ;;  %v66_v19 = vpop.xlane.xlu1 %65 }
  0x97   :  { %v87_v23 = vsub.f32 %v435_v24, %v69_v21  ;;  %v63_v27 = vpop.xlane.xlu0 %62  ;;  %v86_v32 = vsub.f32 %v440_v25, %v66_v19 }
  0x98   :  { %v85_v28 = vsub.f32 %v445_v26, %v63_v27 }
  0x99   :  { %v503_v29 = vpop.eup %307  ;;  %v117_v31 = vmul.f32 1.442695, %v87_v23  ;;  %v115_v26 = vmul.f32 1.442695, %v86_v32 }
  0x9a   :  { %v506_v33 = vpop.eup %309  ;;  %v113_v34 = vmul.f32 1.442695, %v85_v28  ;;  %v154_v35 = vsel %vm24_vm0, %v503_v29, 0.0 }
  0x9b   :  { %313 = vpow2.f32 %v117_v31  ;;  %v148_v24 = vsel %vm24_vm0, %v506_v33, 0.0  ;;  %155 = vadd.xlane.f32.xlu0 %v154_v35  ;;  %v514_v37 = vpop.eup %311 }
  0x9c   :  { %315 = vpow2.f32 %v113_v34  ;;  %149 = vadd.xlane.f32.xlu1 %v148_v24  ;;  %v151_v43 = vsel %vm24_vm0, %v514_v37, 0.0 }
  0x9d   :  { %143 = vadd.xlane.f32.xlu2 %v142_v36  ;;  %317 = vpow2.f32 %v115_v26 }
  0x9f   :  { %v72_v25 = vpop.xlane.xlu0 %71 }
  0xa0   :  { %v88_v38 = vsub.f32 %v456_v30, %v72_v25 }
  0xa1   :  { %v517_v39 = vpop.eup %313 }
  0xa2   :  { %v519_v40 = vpop.eup %315  ;;  %v119_v41 = vmul.f32 1.442695, %v88_v38  ;;  %v163_v42 = vsel %vm24_vm0, %v517_v39, 0.0 }
  0xa3   :  { %v157_v44 = vsel %vm24_vm0, %v519_v40, 0.0  ;;  %164 = vadd.xlane.f32.xlu0 %v163_v42  ;;  %v527_v30 = vpop.eup %317 }
  0xa4   :  { %319 = vpow2.f32 %v119_v41  ;;  %158 = vadd.xlane.f32.xlu1 %v157_v44  ;;  %v160_v46 = vsel %vm24_vm0, %v527_v30, 0.0 }
  0xa5   :  { %152 = vadd.xlane.f32.xlu2 %v151_v43 }
  0xaa   :  { %v529_v45 = vpop.eup %319 }
  0xab   :  { %v166_v47 = vsel %vm24_vm0, %v529_v45, 0.0 }
  0xac   :  { %167 = vadd.xlane.f32.xlu1 %v166_v47 }
  0xad   :  { %161 = vadd.xlane.f32.xlu2 %v160_v46 }
  0xf6   :  { %v129_v51 = vpop.xlane.xlu0 %128 }
  0xf7   :  { %v123_v49 = vpop.xlane.xlu1 %122 }
  0xf8   :  { %321 = vrcp.f32 %v123_v49 }
  0xf9   :  { %323 = vrcp.f32 %v129_v51 }
  0xfe   :  { %v322_v52 = vpop.eup %321 }
  0xff   :  { %v185_v53 = vmul.f32 %v322_v52, %v123_v49  ;;  %v324_v58 = vpop.eup %323  ;;  %v132_v60 = vpop.xlane.xlu1 %131 }
 0x100   :  { %v126_v54 = vpop.xlane.xlu2 %125  ;;  %v187_v0 = vmul.f32 %v324_v58, %v129_v51 }
 0x101   :  { %v201_v55 = vsub.f32 2.0, %v185_v53  ;;  %325 = vrcp.f32 %v126_v54 }
 0x102   :  { %327 = vrcp.f32 %v132_v60  ;;  %v203_v4 = vsub.f32 2.0, %v187_v0 }
 0x103   :  { %v217_v56 = vmul.f32 %v322_v52, %v201_v55 }
 0x104   :  { %v219_v9 = vmul.f32 %v324_v58, %v203_v4 }
 0x105   :  { %v233_v57 = vmul.f32 %v463_v50, %v217_v56  ;;  %v138_v50 = vpop.xlane.xlu0 %137 }
 0x106   :  { %v235_v13 = vmul.f32 %v461_v48, %v219_v9 }
 0x107   :  { %v326_v61 = vpop.eup %325  ;;  %249 = vxpose.xlu2.b32.start [1/16] (narrow) %v233_v57, 32  ;;  %v141_v20 = vpop.xlane.xlu1 %140 }
 0x108   :  { %v186_v63 = vmul.f32 %v326_v61, %v126_v54  ;;  %v135_v5 = vpop.xlane.xlu2 %134  ;;  %v328_v8 = vpop.eup %327 }
 0x109   :  { %329 = vrcp.f32 %v135_v5  ;;  %v188_v10 = vmul.f32 %v328_v8, %v132_v60 }
 0x10a   :  { %v202_v2 = vsub.f32 2.0, %v186_v63  ;;  %331 = vrcp.f32 %v138_v50 }
 0x10b   :  { %v204_v12 = vsub.f32 2.0, %v188_v10  ;;  %333 = vrcp.f32 %v141_v20 }
 0x10c   :  { %v218_v3 = vmul.f32 %v326_v61, %v202_v2 }
 0x10d   :  { %v220_v16 = vmul.f32 %v328_v8, %v204_v12  ;;  %v147_v36 = vpop.xlane.xlu0 %146 }
 0x10e   :  { %v234_v6 = vmul.f32 %v478_v1, %v218_v3 }
 0x10f   :  { %v330_v15 = vpop.eup %329  ;;  %v236_v21 = vmul.f32 %v474_v62, %v220_v16  ;;  %v150_v41 = vpop.xlane.xlu1 %149 }
 0x110   :  { %250 = vxpose.xlu2.b32.cont [2/16] (narrow) %v234_v6, 32  ;;  %v189_v17 = vmul.f32 %v330_v15, %v135_v5  ;;  %v332_v19 = vpop.eup %331  ;;  %v144_v28 = vpop.xlane.xlu2 %143 }
 0x111   :  { %v190_v1 = vmul.f32 %v332_v19, %v138_v50  ;;  %v334_v32 = vpop.eup %333  ;;  %335 = vrcp.f32 %v144_v28 }
 0x112   :  { %v205_v18 = vsub.f32 2.0, %v189_v17  ;;  %v191_v34 = vmul.f32 %v334_v32, %v141_v20  ;;  %337 = vrcp.f32 %v147_v36 }
 0x113   :  { %v206_v27 = vsub.f32 2.0, %v190_v1  ;;  %339 = vrcp.f32 %v150_v41 }
 0x114   :  { %v221_v23 = vmul.f32 %v330_v15, %v205_v18  ;;  %v207_v35 = vsub.f32 2.0, %v191_v34 }
 0x115   :  { %v222_v48 = vmul.f32 %v332_v19, %v206_v27  ;;  %v156_v54 = vpop.xlane.xlu0 %155 }
 0x116   :  { %v237_v31 = vmul.f32 %v484_v7, %v221_v23  ;;  %v223_v62 = vmul.f32 %v334_v32, %v207_v35 }
 0x117   :  { %v238_v24 = vmul.f32 %v471_v59, %v222_v48  ;;  %v336_v26 = vpop.eup %335  ;;  %v159_v60 = vpop.xlane.xlu1 %158 }
 0x118   :  { %251 = vxpose.xlu2.b32.cont [3/16] (narrow) %v235_v13, 32  ;;  %v192_v25 = vmul.f32 %v336_v26, %v144_v28  ;;  %v239_v42 = vmul.f32 %v491_v14, %v223_v62  ;;  %v338_v43 = vpop.eup %337  ;;  %v153_v47 = vpop.xlane.xlu2 %152 }
 0x119   :  { %v193_v7 = vmul.f32 %v338_v43, %v147_v36  ;;  %v340_v51 = vpop.eup %339  ;;  %341 = vrcp.f32 %v153_v47 }
 0x11a   :  { %v208_v38 = vsub.f32 2.0, %v192_v25  ;;  %v194_v52 = vmul.f32 %v340_v51, %v150_v41  ;;  %343 = vrcp.f32 %v156_v54 }
 0x11b   :  { %v209_v46 = vsub.f32 2.0, %v193_v7  ;;  %345 = vrcp.f32 %v159_v60 }
 0x11c   :  { %v224_v44 = vmul.f32 %v336_v26, %v208_v38  ;;  %v210_v53 = vsub.f32 2.0, %v194_v52 }
 0x11d   :  { %v225_v59 = vmul.f32 %v338_v43, %v209_v46  ;;  %v165_v9 = vpop.xlane.xlu0 %164 }
 0x11e   :  { %v240_v49 = vmul.f32 %v499_v22, %v224_v44  ;;  %v226_v14 = vmul.f32 %v340_v51, %v210_v53 }
 0x11f   :  { %v241_v55 = vmul.f32 %v488_v11, %v225_v59  ;;  %v342_v56 = vpop.eup %341  ;;  %v168_v15 = vpop.xlane.xlu1 %167 }
 0x120   :  { %252 = vxpose.xlu2.b32.cont [4/16] (narrow) %v236_v21, 32  ;;  %v195_v57 = vmul.f32 %v342_v56, %v153_v47  ;;  %v242_v61 = vmul.f32 %v506_v33, %v226_v14  ;;  %v344_v63 = vpop.eup %343  ;;  %v162_v3 = vpop.xlane.xlu2 %161 }
 0x121   :  { %v196_v22 = vmul.f32 %v344_v63, %v156_v54  ;;  %v346_v5 = vpop.eup %345  ;;  %347 = vrcp.f32 %v162_v3 }
 0x122   :  { %v211_v58 = vsub.f32 2.0, %v195_v57  ;;  %v197_v6 = vmul.f32 %v346_v5, %v159_v60  ;;  %349 = vrcp.f32 %v165_v9 }
 0x123   :  { %v212_v2 = vsub.f32 2.0, %v196_v22  ;;  %351 = vrcp.f32 %v168_v15 }
 0x124   :  { %v227_v0 = vmul.f32 %v342_v56, %v211_v58  ;;  %v213_v8 = vsub.f32 2.0, %v197_v6 }
 0x125   :  { %v228_v11 = vmul.f32 %v344_v63, %v212_v2 }
 0x126   :  { %v243_v4 = vmul.f32 %v514_v37, %v227_v0  ;;  %v229_v33 = vmul.f32 %v346_v5, %v213_v8 }
 0x127   :  { %v244_v10 = vmul.f32 %v503_v29, %v228_v11  ;;  %v348_v12 = vpop.eup %347 }
 0x128   :  { %253 = vxpose.xlu2.b32.cont [5/16] (narrow) %v237_v31, 32  ;;  %v198_v50 = vmul.f32 %v348_v12, %v162_v3  ;;  %v245_v16 = vmul.f32 %v519_v40, %v229_v33  ;;  %v350_v17 = vpop.eup %349 }
 0x129   :  { %v199_v37 = vmul.f32 %v350_v17, %v165_v9  ;;  %v352_v19 = vpop.eup %351 }
 0x12a   :  { %v214_v13 = vsub.f32 2.0, %v198_v50  ;;  %v200_v1 = vmul.f32 %v352_v19, %v168_v15 }
 0x12b   :  { %v215_v20 = vsub.f32 2.0, %v199_v37 }
 0x12c   :  { %v230_v18 = vmul.f32 %v348_v12, %v214_v13  ;;  %v216_v23 = vsub.f32 2.0, %v200_v1 }
 0x12d   :  { %v231_v29 = vmul.f32 %v350_v17, %v215_v20 }
 0x12e   :  { %v246_v21 = vmul.f32 %v527_v30, %v230_v18  ;;  %v232_v28 = vmul.f32 %v352_v19, %v216_v23 }
 0x12f   :  { %v247_v27 = vmul.f32 %v517_v39, %v231_v29 }
 0x130   :  { %254 = vxpose.xlu2.b32.cont [6/16] (narrow) %v238_v24, 32  ;;  %v248_v31 = vmul.f32 %v529_v45, %v232_v28 }
 0x138   :  { %255 = vxpose.xlu2.b32.cont [7/16] (narrow) %v239_v42, 32 }
 0x140   :  { %256 = vxpose.xlu2.b32.cont [8/16] (narrow) %v240_v49, 32 }
 0x148   :  { %257 = vxpose.xlu2.b32.cont [9/16] (narrow) %v241_v55, 32 }
 0x150   :  { %258 = vxpose.xlu2.b32.cont [10/16] (narrow) %v242_v61, 32 }
 0x158   :  { %259 = vxpose.xlu2.b32.cont [11/16] (narrow) %v243_v4, 32 }
 0x160   :  { %260 = vxpose.xlu2.b32.cont [12/16] (narrow) %v244_v10, 32 }
 0x168   :  { %261 = vxpose.xlu2.b32.cont [13/16] (narrow) %v245_v16, 32 }
 0x170   :  { %262 = vxpose.xlu2.b32.cont [14/16] (narrow) %v246_v21, 32 }
 0x178   :  { %263 = vxpose.xlu2.b32.cont [15/16] (narrow) %v247_v27, 32 }
 0x180   :  { %264 = vxpose.xlu2.b32.end [16/16] (narrow) %v248_v31, 32 }
 0x1a1   :  { %v265_v40 = vpop.trf.xlu2 }
 0x1a2   :  { %281 = vst [vmem:[%s564_s1] sm:$0xff] %v265_v40 }
 0x1a9   :  { %v266_v32 = vpop.trf.xlu2 }
 0x1aa   :  { %282 = vst [vmem:[%s564_s1 + $0x8] sm:$0xff] %v266_v32 }
 0x1b1   :  { %v267_v30 = vpop.trf.xlu2 }
 0x1b2   :  { %283 = vst [vmem:[%s564_s1 + $0x10] sm:$0xff] %v267_v30 }
 0x1b9   :  { %v268_v39 = vpop.trf.xlu2 }
 0x1ba   :  { %284 = vst [vmem:[%s564_s1 + $0x18] sm:$0xff] %v268_v39 }

</bundles_post_ra>
